<compile_context>
chip_gen: v5e
topology: v5e:2x2
jax: 0.10.0
libtpu: 0.0.40
codegen_flags: <defaults>
</compile_context>

<pallas_src>
import functools
import math

import jax
import jax.numpy as jnp
from jax.experimental import pallas as pl
from jax.experimental.pallas import tpu as pltpu

HIDDEN = 128


def _round_up(x, m):
    return (x + m - 1) // m * m


def _cdiv(a, b):
    return (a + b - 1) // b


def _num_tensorcores_per_chip():
    """v7x exposes 2 TensorCores behind one device; treat everything else as 1."""
    try:
        kind = jax.devices()[0].device_kind.lower()
    except Exception:
        return 1
    return 2 if "v7" in kind else 1


def dqn_kernel(x_ref, w1_ref, b1_ref, w2_ref, b2_ref, w3t_ref, b3_ref, o_ref):
    # ---- layer 1: K is tiny (n_obs), keep it off the MXU -> VPU broadcast-FMAs.
    x = x_ref[...]                                   # (tm, n_obs) f32
    w1 = w1_ref[...]                                 # (n_obs, H)  f32
    tm = x.shape[0]
    n_obs = x.shape[1]
    hidden = w1.shape[1]
    acc1 = jnp.broadcast_to(b1_ref[...], (tm, hidden))       # hoisted broadcast
    for k in range(n_obs):                           # static unroll (n_obs == 4)
        acc1 = acc1 + x[:, k:k + 1] * w1[k:k + 1, :]
    h1 = jnp.maximum(acc1, 0.0)                      # f32 ReLU

    # ---- layer 2: MXU, bf16 inputs, f32 accumulate; bias/ReLU in f32.
    h2 = jnp.dot(h1.astype(w2_ref.dtype), w2_ref[...],
                 preferred_element_type=jnp.float32)
    h2 = jnp.maximum(h2 + b2_ref[...], 0.0)          # (tm, H) f32

    # ---- layer 3: n_actions is tiny -> VPU multiply + lane reduction per action
    # (no padded MXU pass, no (tm, 128) f32 result to spill/store).
    w3t = w3t_ref[...]                               # (n_actions, H) f32
    n_actions = w3t.shape[0]
    lane_ids = jax.lax.broadcasted_iota(jnp.int32, (tm, n_actions), 1)
    q = jnp.broadcast_to(b3_ref[...], (tm, n_actions))       # (tm, n_actions)
    for a in range(n_actions):                       # static unroll (n_actions == 2)
        qa = jnp.sum(h2 * w3t[a:a + 1, :], axis=-1, keepdims=True)   # (tm, 1)
        q = q + jnp.where(lane_ids == a, qa, 0.0)
    o_ref[...] = q                                   # narrow masked store, cheap


@functools.partial(jax.jit, static_argnames=("n_actions", "block_b", "num_cores"))
def dqn_forward(x, params, n_actions, block_b=2048, num_cores=None):
    """Fused 3-layer MLP forward. x: (B, n_obs) float32 -> (B, n_actions) float32."""
    w1, b1, w2, b2, w3t, b3 = params
    B, n_obs = x.shape
    hidden = w1.shape[1]

    if num_cores is None:
        num_cores = _num_tensorcores_per_chip()

    # Grid sizing: one big tile on single-TC chips; an even >=num_cores split on
    # multi-TC chips so the "parallel" axis actually shards.  Tiles are multiples
    # of 8 rows (sublane) and capped at block_b.
    b8 = _round_up(max(B, 8), 8)
    steps = max(num_cores, _cdiv(b8, block_b))
    steps = _cdiv(steps, num_cores) * num_cores
    tm = _round_up(_cdiv(b8, steps), 8)
    b_pad = tm * steps
    if b_pad != B:
        x = jnp.pad(x, ((0, b_pad - B), (0, 0)))

    resident = lambda i: (0, 0)                      # weights stay VMEM-resident

    flops = 2 * b_pad * (n_obs * hidden + hidden * hidden + hidden * n_actions)
    bytes_accessed = (b_pad * n_obs * 4                       # x
                      + w1.size * 4 + b1.size * 4
                      + w2.size * 2 + b2.size * 4
                      + w3t.size * 4 + b3.size * 4
                      + b_pad * n_actions * 4)                # output (un-padded)

    out = pl.pallas_call(
        dqn_kernel,
        out_shape=jax.ShapeDtypeStruct((b_pad, n_actions), jnp.float32),
        grid=(steps,),
        in_specs=[
            pl.BlockSpec((tm, n_obs), lambda i: (i, 0)),
            pl.BlockSpec(w1.shape, resident),
            pl.BlockSpec(b1.shape, resident),
            pl.BlockSpec(w2.shape, resident),
            pl.BlockSpec(b2.shape, resident),
            pl.BlockSpec(w3t.shape, resident),
            pl.BlockSpec(b3.shape, resident),
        ],
        out_specs=pl.BlockSpec((tm, n_actions), lambda i: (i, 0)),
        compiler_params=pltpu.CompilerParams(
            dimension_semantics=("parallel",)),
        cost_estimate=pl.CostEstimate(
            flops=flops, transcendentals=0, bytes_accessed=bytes_accessed),
    )(x, w1, b1, w2, b2, w3t, b3)

    if b_pad != B:
        out = out[:B]                                # tiny (B, n_actions) slice
    return out


def init_dqn_params(key, n_observations, n_actions, hidden=HIDDEN):
    """PyTorch nn.Linear default init (U[-1/sqrt(fan_in), 1/sqrt(fan_in)]).

    Layers 1/2 weights are stored (in_features, out_features) so the kernel
    computes y = x @ W + b (== PyTorch's x @ W_t.T + b).  Layer-2 weights are
    bf16 for the MXU; layer-3 weights are kept f32 and TRANSPOSED
    (n_actions, hidden) for the in-kernel per-action lane reduction.
    """
    keys = jax.random.split(key, 6)

    def linear(kw, kb, fan_in, fan_out):
        bound = 1.0 / math.sqrt(fan_in)
        w = jax.random.uniform(kw, (fan_in, fan_out), jnp.float32, -bound, bound)
        b = jax.random.uniform(kb, (1, fan_out), jnp.float32, -bound, bound)
        return w, b

    w1, b1 = linear(keys[0], keys[1], n_observations, hidden)
    w2, b2 = linear(keys[2], keys[3], hidden, hidden)
    w3, b3 = linear(keys[4], keys[5], hidden, n_actions)

    return (w1, b1,
            w2.astype(jnp.bfloat16), b2,
            jnp.transpose(w3), b3)                   # w3t: (n_actions, hidden) f32


def _reference(x, params):
    """Pure-JAX reference matching the kernel's bf16-layer-2 / f32 math."""
    w1, b1, w2, b2, w3t, b3 = params
    f32 = jnp.float32
    h1 = jnp.maximum(x @ w1 + b1, 0.0)
    h1b = h1.astype(jnp.bfloat16).astype(f32)
    h2 = jnp.maximum(h1b @ w2.astype(f32) + b2, 0.0)
    return h2 @ jnp.transpose(w3t) + b3


if __name__ == "__main__":
    # CartPole-v1: n_observations = 4, n_actions = 2
    n_observations = 4
    n_actions = 2

    key = jax.random.PRNGKey(0)
    k_params, k_x1, k_x2 = jax.random.split(key, 3)
    params = init_dqn_params(k_params, n_observations, n_actions)

    # Small action-selection style batch (grid auto-sized; 1 step on single-TC chips).
    x_small = jax.random.normal(k_x1, (8, n_observations), jnp.float32)
    out_small = jax.block_until_ready(dqn_forward(x_small, params, n_actions))
    assert out_small.shape == (8, n_actions)
    ref_small = _reference(x_small, params)
    assert jnp.allclose(out_small, ref_small, atol=2e-3, rtol=2e-3)

    # Replay-batch style call exercising a multi-step "parallel" grid + padding path.
    x_big = jax.random.normal(k_x2, (1000, n_observations), jnp.float32)
    out_big = jax.block_until_ready(
        dqn_forward(x_big, params, n_actions, block_b=256, num_cores=2))
    assert out_big.shape == (1000, n_actions)
    ref_big = _reference(x_big, params)
    assert jnp.allclose(out_big, ref_big, atol=2e-3, rtol=2e-3)

    print("KERNEL_OK")
</pallas_src>

<mosaic_0001>
module attributes {stable_mosaic.version = 11 : i64} {
  func.func @dqn_kernel(%arg0: i32, %arg1: memref<8x4xf32, #tpu.memory_space<vmem>>, %arg2: memref<4x128xf32, #tpu.memory_space<vmem>>, %arg3: memref<1x128xf32, #tpu.memory_space<vmem>>, %arg4: memref<128x128xbf16, #tpu.memory_space<vmem>>, %arg5: memref<1x128xf32, #tpu.memory_space<vmem>>, %arg6: memref<2x128xf32, #tpu.memory_space<vmem>>, %arg7: memref<1x2xf32, #tpu.memory_space<vmem>>, %arg8: memref<8x2xf32, #tpu.memory_space<vmem>>) attributes {dimension_semantics = [#tpu.dimension_semantics<parallel>], iteration_bounds = array<i64: 1>, scalar_prefetch = 0 : i64, scratch_operands = 0 : i64, tpu.core_type = #tpu.core_type<tc>, window_params = [{transform_indices = @transform_0, window_bounds = array<i64: 8, 4>}, {pipeline_mode = #tpu.pipeline_mode<synchronous>, transform_indices = @transform_1, window_bounds = array<i64: 4, 128>}, {pipeline_mode = #tpu.pipeline_mode<synchronous>, transform_indices = @transform_2, window_bounds = array<i64: 1, 128>}, {pipeline_mode = #tpu.pipeline_mode<synchronous>, transform_indices = @transform_3, window_bounds = array<i64: 128, 128>}, {pipeline_mode = #tpu.pipeline_mode<synchronous>, transform_indices = @transform_4, window_bounds = array<i64: 1, 128>}, {pipeline_mode = #tpu.pipeline_mode<synchronous>, transform_indices = @transform_5, window_bounds = array<i64: 2, 128>}, {pipeline_mode = #tpu.pipeline_mode<synchronous>, transform_indices = @transform_6, window_bounds = array<i64: 1, 2>}, {transform_indices = @transform_7, window_bounds = array<i64: 8, 2>}]} {
    %c0 = arith.constant 0 : index
    %c0_0 = arith.constant 0 : index
    %0 = vector.load %arg1[%c0, %c0_0] : memref<8x4xf32, #tpu.memory_space<vmem>>, vector<8x4xf32>
    %c0_1 = arith.constant 0 : index
    %c0_2 = arith.constant 0 : index
    %1 = vector.load %arg2[%c0_1, %c0_2] : memref<4x128xf32, #tpu.memory_space<vmem>>, vector<4x128xf32>
    %c0_3 = arith.constant 0 : index
    %c0_4 = arith.constant 0 : index
    %2 = vector.load %arg3[%c0_3, %c0_4] : memref<1x128xf32, #tpu.memory_space<vmem>>, vector<1x128xf32>
    %3 = vector.shape_cast %2 : vector<1x128xf32> to vector<1x128xf32>
    %4 = vector.broadcast %3 : vector<1x128xf32> to vector<8x128xf32>
    %5 = vector.extract_strided_slice %0 {offsets = [0, 0], sizes = [8, 1], strides = [1, 1]} : vector<8x4xf32> to vector<8x1xf32>
    %6 = vector.extract_strided_slice %1 {offsets = [0, 0], sizes = [1, 128], strides = [1, 1]} : vector<4x128xf32> to vector<1x128xf32>
    %7 = vector.broadcast %5 : vector<8x1xf32> to vector<8x128xf32>
    %8 = vector.broadcast %6 : vector<1x128xf32> to vector<8x128xf32>
    %9 = arith.mulf %7, %8 : vector<8x128xf32>
    %10 = arith.addf %4, %9 : vector<8x128xf32>
    %11 = vector.extract_strided_slice %0 {offsets = [0, 1], sizes = [8, 1], strides = [1, 1]} : vector<8x4xf32> to vector<8x1xf32>
    %12 = vector.extract_strided_slice %1 {offsets = [1, 0], sizes = [1, 128], strides = [1, 1]} : vector<4x128xf32> to vector<1x128xf32>
    %13 = vector.broadcast %11 : vector<8x1xf32> to vector<8x128xf32>
    %14 = vector.broadcast %12 : vector<1x128xf32> to vector<8x128xf32>
    %15 = arith.mulf %13, %14 : vector<8x128xf32>
    %16 = arith.addf %10, %15 : vector<8x128xf32>
    %17 = vector.extract_strided_slice %0 {offsets = [0, 2], sizes = [8, 1], strides = [1, 1]} : vector<8x4xf32> to vector<8x1xf32>
    %18 = vector.extract_strided_slice %1 {offsets = [2, 0], sizes = [1, 128], strides = [1, 1]} : vector<4x128xf32> to vector<1x128xf32>
    %19 = vector.broadcast %17 : vector<8x1xf32> to vector<8x128xf32>
    %20 = vector.broadcast %18 : vector<1x128xf32> to vector<8x128xf32>
    %21 = arith.mulf %19, %20 : vector<8x128xf32>
    %22 = arith.addf %16, %21 : vector<8x128xf32>
    %23 = vector.extract_strided_slice %0 {offsets = [0, 3], sizes = [8, 1], strides = [1, 1]} : vector<8x4xf32> to vector<8x1xf32>
    %24 = vector.extract_strided_slice %1 {offsets = [3, 0], sizes = [1, 128], strides = [1, 1]} : vector<4x128xf32> to vector<1x128xf32>
    %25 = vector.broadcast %23 : vector<8x1xf32> to vector<8x128xf32>
    %26 = vector.broadcast %24 : vector<1x128xf32> to vector<8x128xf32>
    %27 = arith.mulf %25, %26 : vector<8x128xf32>
    %28 = arith.addf %22, %27 : vector<8x128xf32>
    %cst = arith.constant 0.000000e+00 : f32
    %29 = vector.broadcast %cst : f32 to vector<8x128xf32>
    %30 = arith.maximumf %28, %29 : vector<8x128xf32>
    %31 = arith.truncf %30 : vector<8x128xf32> to vector<8x128xbf16>
    %c0_5 = arith.constant 0 : index
    %c0_6 = arith.constant 0 : index
    %32 = vector.load %arg4[%c0_5, %c0_6] : memref<128x128xbf16, #tpu.memory_space<vmem>>, vector<128x128xbf16>
    %cst_7 = arith.constant dense<0.000000e+00> : vector<8x128xf32>
    %33 = tpu.matmul %31, %32, %cst_7 {dimension_numbers = #tpu.dot_dimension_numbers<[1], [0], [0], [1], [0, 0, 1, 1], [], []>} : vector<8x128xbf16>, vector<128x128xbf16>, vector<8x128xf32> -> vector<8x128xf32>
    %c0_8 = arith.constant 0 : index
    %c0_9 = arith.constant 0 : index
    %34 = vector.load %arg5[%c0_8, %c0_9] : memref<1x128xf32, #tpu.memory_space<vmem>>, vector<1x128xf32>
    %35 = vector.broadcast %34 : vector<1x128xf32> to vector<8x128xf32>
    %36 = arith.addf %33, %35 : vector<8x128xf32>
    %cst_10 = arith.constant 0.000000e+00 : f32
    %37 = vector.broadcast %cst_10 : f32 to vector<8x128xf32>
    %38 = arith.maximumf %36, %37 : vector<8x128xf32>
    %c0_11 = arith.constant 0 : index
    %c0_12 = arith.constant 0 : index
    %39 = vector.load %arg6[%c0_11, %c0_12] : memref<2x128xf32, #tpu.memory_space<vmem>>, vector<2x128xf32>
    %40 = tpu.iota {dimensions = array<i32: 1>} : vector<8x2xi32>
    %c0_13 = arith.constant 0 : index
    %c0_14 = arith.constant 0 : index
    %41 = vector.load %arg7[%c0_13, %c0_14] : memref<1x2xf32, #tpu.memory_space<vmem>>, vector<1x2xf32>
    %42 = vector.shape_cast %41 : vector<1x2xf32> to vector<1x2xf32>
    %43 = vector.broadcast %42 : vector<1x2xf32> to vector<8x2xf32>
    %44 = vector.extract_strided_slice %39 {offsets = [0, 0], sizes = [1, 128], strides = [1, 1]} : vector<2x128xf32> to vector<1x128xf32>
    %45 = vector.broadcast %44 : vector<1x128xf32> to vector<8x128xf32>
    %46 = arith.mulf %38, %45 : vector<8x128xf32>
    %cst_15 = arith.constant dense<0.000000e+00> : vector<8xf32>
    %47 = vector.multi_reduction <add>, %46, %cst_15 [1] : vector<8x128xf32> to vector<8xf32>
    %48 = vector.shape_cast %47 : vector<8xf32> to vector<8x1xf32>
    %c0_i32 = arith.constant 0 : i32
    %49 = vector.broadcast %c0_i32 : i32 to vector<8x2xi32>
    %50 = arith.cmpi eq, %40, %49 : vector<8x2xi32>
    %cst_16 = arith.constant 0.000000e+00 : f32
    %51 = vector.shape_cast %48 : vector<8x1xf32> to vector<8x1xf32>
    %52 = vector.broadcast %51 : vector<8x1xf32> to vector<8x2xf32>
    %53 = vector.broadcast %cst_16 : f32 to vector<8x2xf32>
    %54 = arith.select %50, %52, %53 : vector<8x2xi1>, vector<8x2xf32>
    %55 = arith.addf %43, %54 : vector<8x2xf32>
    %56 = vector.extract_strided_slice %39 {offsets = [1, 0], sizes = [1, 128], strides = [1, 1]} : vector<2x128xf32> to vector<1x128xf32>
    %57 = vector.broadcast %56 : vector<1x128xf32> to vector<8x128xf32>
    %58 = arith.mulf %38, %57 : vector<8x128xf32>
    %cst_17 = arith.constant dense<0.000000e+00> : vector<8xf32>
    %59 = vector.multi_reduction <add>, %58, %cst_17 [1] : vector<8x128xf32> to vector<8xf32>
    %60 = vector.shape_cast %59 : vector<8xf32> to vector<8x1xf32>
    %c1_i32 = arith.constant 1 : i32
    %61 = vector.broadcast %c1_i32 : i32 to vector<8x2xi32>
    %62 = arith.cmpi eq, %40, %61 : vector<8x2xi32>
    %cst_18 = arith.constant 0.000000e+00 : f32
    %63 = vector.shape_cast %60 : vector<8x1xf32> to vector<8x1xf32>
    %64 = vector.broadcast %63 : vector<8x1xf32> to vector<8x2xf32>
    %65 = vector.broadcast %cst_18 : f32 to vector<8x2xf32>
    %66 = arith.select %62, %64, %65 : vector<8x2xi1>, vector<8x2xf32>
    %67 = arith.addf %55, %66 : vector<8x2xf32>
    %c0_19 = arith.constant 0 : index
    %c0_20 = arith.constant 0 : index
    %68 = vector.load %arg8[%c0_19, %c0_20] : memref<8x2xf32, #tpu.memory_space<vmem>>, vector<8x2xf32>
    tpu.vector_store %arg8[%c0_19, %c0_20], %67 {strides = array<i32>} : memref<8x2xf32, #tpu.memory_space<vmem>>, vector<8x2xf32>,
    return
  }
  func.func @transform_0(%arg0: i32) -> (i32, i32) {
    %c0_i32 = arith.constant 0 : i32
    %c0_i32_0 = arith.constant 0 : i32
    return %arg0, %c0_i32 : i32, i32
  }
  func.func @transform_1(%arg0: i32) -> (i32, i32) {
    %c0_i32 = arith.constant 0 : i32
    %c0_i32_0 = arith.constant 0 : i32
    %c0_i32_1 = arith.constant 0 : i32
    return %c0_i32, %c0_i32_0 : i32, i32
  }
  func.func @transform_2(%arg0: i32) -> (i32, i32) {
    %c0_i32 = arith.constant 0 : i32
    %c0_i32_0 = arith.constant 0 : i32
    %c0_i32_1 = arith.constant 0 : i32
    return %c0_i32, %c0_i32_0 : i32, i32
  }
  func.func @transform_3(%arg0: i32) -> (i32, i32) {
    %c0_i32 = arith.constant 0 : i32
    %c0_i32_0 = arith.constant 0 : i32
    %c0_i32_1 = arith.constant 0 : i32
    return %c0_i32, %c0_i32_0 : i32, i32
  }
  func.func @transform_4(%arg0: i32) -> (i32, i32) {
    %c0_i32 = arith.constant 0 : i32
    %c0_i32_0 = arith.constant 0 : i32
    %c0_i32_1 = arith.constant 0 : i32
    return %c0_i32, %c0_i32_0 : i32, i32
  }
  func.func @transform_5(%arg0: i32) -> (i32, i32) {
    %c0_i32 = arith.constant 0 : i32
    %c0_i32_0 = arith.constant 0 : i32
    %c0_i32_1 = arith.constant 0 : i32
    return %c0_i32, %c0_i32_0 : i32, i32
  }
  func.func @transform_6(%arg0: i32) -> (i32, i32) {
    %c0_i32 = arith.constant 0 : i32
    %c0_i32_0 = arith.constant 0 : i32
    %c0_i32_1 = arith.constant 0 : i32
    return %c0_i32, %c0_i32_0 : i32, i32
  }
  func.func @transform_7(%arg0: i32) -> (i32, i32) {
    %c0_i32 = arith.constant 0 : i32
    %c0_i32_0 = arith.constant 0 : i32
    return %arg0, %c0_i32 : i32, i32
  }
}

</mosaic_0001>

<bundles_post_ra>
// kernel: dqn_forward.1
= control target key start
LH: loop header
LB: loop body
LE: loop exit
PB: predicated region body
PF: predicated region fallthrough
CT: control target
= control target key end

     0   :  { %12 = vsyncpa [#allocation3], 0  ;;  %s270_s27 = smov [#allocation2]   ;;  %s271_s29 = smov 64   ;;  %s341_s0 = inlined_call_operand.vmem [shape: f32[8,4], index: 0, kind: input, shape index: {}]   ;;  %s342_s1 = inlined_call_operand.vmem [shape: f32[4,128], index: 1, kind: input, shape index: {}]   ;;  %s343_s2 = inlined_call_operand.vmem [shape: f32[1,128], index: 2, kind: input, shape index: {}]   ;;  %s344_s3 = inlined_call_operand.hbm [shape: bf16[128,128], index: 3, kind: input, shape index: {}]   ;;  %s345_s4 = inlined_call_operand.vmem [shape: f32[1,128], index: 4, kind: input, shape index: {}]   ;;  %s346_s5 = inlined_call_operand.vmem [shape: f32[2,128], index: 5, kind: input, shape index: {}]   ;;  %s347_s6 = inlined_call_operand.vmem [shape: f32[1,2], index: 6, kind: input, shape index: {}]   ;;  %s348_s7 = inlined_call_operand.vmem [shape: f32[8,2], index: 7, kind: output, shape index: {}]  }
   0x1   :  { %s23_s26 = sshll.u32 %s344_s3, 4  ;;  %s25_s28 = sshll.u32 %s270_s27, 4  ;;  %s24_s26 = int_to_ptr.hbm [resolvable:$true] %s23_s26  ;;  %s26_s28 = int_to_ptr.vmem [resolvable:$true] %s25_s28 }
   0x2   :  { %s272_s30 = smov 4  }
   0x3   :  { %31 = dma.hbm_to_vmem [thread:$0]  %s24_s26, 1024, %s26_s28, [#allocation3], %s271_s29, %s271_s29, %s272_s30  }
   0x4   :  { %268 = dma.done.wait [#allocation3], 1024  }
   0x5   :  { %269 = vsyncadd [#allocation3], 4294966272  ;;  %v273_v0 = vmov 0   ;;  %v274_v1 = vmov 2   ;;  %v42_v2 = vld [vmem:[%s341_s0] sm:$0xff]  ;;  %v228_v3 = vld [vmem:[#allocation2 + $0x38] sm:$0xff]  ;;  %v162_v43 = vlaneseq }
   0x6   :  { %236 = vset.pattern.permute.xlu0 %v273_v0  ;;  %238 = vset.pattern.permute.xlu1 %v274_v1  ;;  %v227_v4 = vld [vmem:[#allocation2 + $0x30] sm:$0xff]  ;;  %v226_v5 = vld [vmem:[#allocation2 + $0x28] sm:$0xff]  ;;  %v275_v6 = vmov 1   ;;  %v276_v7 = vmov 3   ;;  %v225_v8 = vld [vmem:[#allocation2 + $0x20] sm:$0xff]  ;;  %vm182_vm2 = vcmask 15360  }
   0x7   :  { %50 = vperm.xlu0 %236, %v42_v2   ;;  %64 = vperm.xlu1 %238, %v42_v2   ;;  %v224_v9 = vld [vmem:[#allocation2 + $0x18] sm:$0xff]  ;;  %v223_v10 = vld [vmem:[#allocation2 + $0x10] sm:$0xff]  ;;  %v222_v11 = vld [vmem:[#allocation2 + $0x8] sm:$0xff]  ;;  %v163_v44 = vand.u32 127, %v162_v43 }
   0x8   :  { %147 = vmatpush.bf16.msra.mxu0 %v228_v3  ;;  %v221_v12 = vld [vmem:[#allocation2] sm:$0xff] }
   0x9   :  { %v43_v13 = vld [vmem:[%s342_s1] sm:$0xf]  ;;  %vm172_vm0 = vcmp.eq.s32.totalorder %v163_v44, 0  ;;  %vm179_vm1 = vcmp.eq.s32.totalorder %v163_v44, 1 }
   0xa   :  { %v53_v16 = vperm.slane %v43_v13, 0  ;;  %v241_v17 = vld [vmem:[%s343_s2] ss:$0 sm:$0xff]  ;;  %v60_v19 = vperm.slane %v43_v13, 1  ;;  %v67_v20 = vperm.slane %v43_v13, 2  ;;  %v74_v21 = vperm.slane %v43_v13, 3 }
   0xb   :  { %v242_v33 = vld [vmem:[%s345_s4] ss:$0 sm:$0xff] }
   0xc   :  { %148 = vmatpush.bf16.msra.mxu0 %v227_v4  ;;  %v161_v34 = vld [vmem:[%s346_s5] sm:$0x3] }
   0xd   :  { %v168_v37 = vperm.slane %v161_v34, 0  ;;  %v175_v41 = vperm.slane %v161_v34, 1  ;;  %v243_v46 = vld [vmem:[%s347_s6] ss:$0 sm:$0xff] }
   0xf   :  { %237 = vset.pattern.permute.xlu0 %v275_v6  ;;  %239 = vset.pattern.permute.xlu1 %v276_v7 }
  0x10   :  { %57 = vperm.xlu0 %237, %v42_v2   ;;  %71 = vperm.xlu1 %239, %v42_v2  }
  0x11   :  { %149 = vmatpush.bf16.msra.mxu0 %v226_v5 }
  0x15   :  { %150 = vmatpush.bf16.msra.mxu0 %v225_v8 }
  0x18   :  { %240 = vset.pattern.permute.xlu0 %v276_v7 }
  0x19   :  { %151 = vmatpush.bf16.msra.mxu0 %v224_v9 }
  0x1d   :  { %152 = vmatpush.bf16.msra.mxu0 %v223_v10 }
  0x21   :  { %153 = vmatpush.bf16.msra.mxu0 %v222_v11 }
  0x25   :  { %154 = vmatpush.bf16.msra.mxu0 %v221_v12 }
  0x79   :  { %v51_v14 = vpop.permute.xlu0 %50  ;;  %v65_v15 = vpop.permute.xlu1 %64 }
  0x7a   :  { %v54_v18 = vmul.f32 %v53_v16, %v51_v14  ;;  %v68_v26 = vmul.f32 %v67_v20, %v65_v15 }
  0x7c   :  { %v55_v24 = vadd.f32 %v241_v17, %v54_v18 }
  0x82   :  { %v58_v22 = vpop.permute.xlu0 %57  ;;  %v72_v23 = vpop.permute.xlu1 %71 }
  0x83   :  { %v61_v25 = vmul.f32 %v60_v19, %v58_v22  ;;  %v75_v28 = vmul.f32 %v74_v21, %v72_v23 }
  0x85   :  { %v62_v27 = vadd.f32 %v61_v25, %v55_v24 }
  0x87   :  { %v69_v29 = vadd.f32 %v68_v26, %v62_v27 }
  0x89   :  { %v76_v30 = vadd.f32 %v75_v28, %v69_v29 }
  0x8b   :  { %v77_v31 = vmax.f32 %v76_v30, 0.0 }
  0x8d   :  { %v78_v32 = vpack.c.bf16 %v77_v31, %v77_v31 }
  0x8f   :  { %155 = vmatmul.bf16.vlgmr.msra.gmra.mxu0 %v78_v32 }
 0x10c   :  { %v156_v35 = vpop.f32.mrf.mxu0 }
 0x10d   :  { %v157_v36 = vadd.f32 %v242_v33, %v156_v35 }
 0x10f   :  { %v160_v38 = vmax.f32 %v157_v36, 0.0 }
 0x111   :  { %v169_v39 = vmul.f32 %v168_v37, %v160_v38  ;;  %v176_v42 = vmul.f32 %v175_v41, %v160_v38 }
 0x113   :  { %170 = vadd.xlane.f32.xlu2 %v169_v39 }
 0x114   :  { %v158_v40 = vpop.f32.mrf.mxu0 }
 0x11b   :  { %177 = vadd.xlane.f32.xlu2 %v176_v42 }
 0x186   :  { %v171_v45 = vpop.xlane.xlu2 %170 }
 0x187   :  { %v173_v47 = vsel %vm172_vm0, %v171_v45, 0.0 }
 0x188   :  { %v174_v48 = vadd.f32 %v243_v46, %v173_v47 }
 0x18e   :  { %v178_v49 = vpop.xlane.xlu2 %177 }
 0x18f   :  { %v180_v50 = vsel %vm179_vm1, %v178_v49, 0.0 }
 0x190   :  { %v181_v51 = vadd.f32 %v180_v50, %v174_v48 }
 0x192   :  { %183 = vst.msk [vmem:[%s348_s7] sm:$0xff] %vm182_vm2, %v181_v51 }
 0x193   :  { %188 = vsyncpa [#allocation3], 1 }

</bundles_post_ra>
